<compile_context>
chip_gen: v7x
topology: tpu7x:2x2x1
jax: 0.10.0
libtpu: 0.0.40
codegen_flags: <defaults>
</compile_context>

<pallas_src>
import jax
import jax.numpy as jnp
from jax.experimental import pallas as pl
from jax.experimental.pallas import tpu as pltpu


def _mul_dropout3_kernel(x_ref, m_ref, o_ref):
    # x_ref: (tb, ts, tc) tile of x
    # m_ref: (tb, 1, tc) scaled keep-mask (mask * 1/(1-p)), broadcast over ts
    # o_ref: (tb, ts, tc) tile of output
    o_ref[...] = x_ref[...] * m_ref[...]


def _sublane_multiple(itemsize: int) -> int:
    """Native sublane packing: 8 rows for 32-bit, 16 for 16-bit, 32 for 8-bit."""
    return max(8, 32 // max(1, itemsize))


def _vmem_limit_bytes() -> int:
    """Per-chip scoped VMEM limit: ~half of physical VMEM, clamped to [32, 64] MiB."""
    default = 32 * 1024 * 1024  # safe on every chip (v7x has only 64 MiB / TC)
    try:
        cap = int(pltpu.get_tpu_info().vmem_capacity_bytes)
        return int(min(max(cap // 2, default), 64 * 1024 * 1024))
    except Exception:
        return default


def _choose_tiles(B: int, S: int, C: int, itemsize: int, vmem_limit: int):
    """Pick (tb, ts, tc) block dims for (tb, ts, tc) x/out tiles.

    Targets ~4 MiB per tile, keeps 2x(in)+2x(out) double-buffered tiles under
    ~75% of the scoped VMEM limit, aligns ts to the dtype's sublane multiple,
    batch-blocks short sequences and channel-blocks very wide C.
    """
    sub = _sublane_multiple(itemsize)
    budget = (3 * vmem_limit) // 4                     # headroom under scoped limit
    max_tile = max(128 * sub * itemsize, budget // 4)  # 4 double-buffered x/out tiles
    target = min(4 * 1024 * 1024, max_tile)

    # Channel tile: whole C unless even a minimum-row tile would blow VMEM.
    tc = C
    min_rows = min(sub, S)
    if min_rows * C * itemsize > max_tile:
        tc = max(128, ((max_tile // (min_rows * itemsize)) // 128) * 128)
        tc = min(tc, C)
    row_bytes = tc * itemsize

    if S > sub and S * row_bytes >= target:
        # Long sequences: one batch element per block, tile the sequence axis.
        tb = 1
        ts = max(sub, min(S, target // row_bytes))
        if ts < S:
            ts = (ts // sub) * sub                     # sublane-aligned partial tiles
    else:
        # Short sequences: take the whole sequence, block the batch axis so the
        # DMAs stay large instead of paying B tiny grid steps.
        ts = S
        tb = min(B, max(1, target // max(1, S * row_bytes)))

    # Megacore balance (v7x: 2 TCs share the "parallel" grid axes): aim for a
    # handful of grid steps whenever the shape allows it.
    for _ in range(8):
        steps = pl.cdiv(B, tb) * pl.cdiv(C, tc) * pl.cdiv(S, ts)
        if steps >= 4:
            break
        if tb > 1:
            tb = max(1, tb // 2)
        elif ts < S or ts > sub:
            new_ts = max(sub, ((ts // 2) // sub) * sub)
            if new_ts == ts:
                break
            ts = new_ts
        else:
            break

    return tb, ts, tc


def mul_for_dropout3(x: jax.Array, scaled_mask: jax.Array,
                     *, donate_x: bool = False) -> jax.Array:
    """Pallas implementation of MulForDropout3.forward: ans = x * (mask*scale).

    x:           (B, S, C)
    scaled_mask: (B, 1, C), already multiplied by 1/(1-p), in x.dtype.
    """
    B, S, C = x.shape
    assert scaled_mask.shape == (B, 1, C), (scaled_mask.shape, x.shape)
    itemsize = jnp.dtype(x.dtype).itemsize

    vmem_limit = _vmem_limit_bytes()
    tb, ts, tc = _choose_tiles(B, S, C, itemsize, vmem_limit)

    # Grid order (batch, channel, seq): the (tb, 1, tc) mask block index only
    # depends on the two outer axes, so it stays resident across the whole
    # (innermost) sequence loop.
    grid = (pl.cdiv(B, tb), pl.cdiv(C, tc), pl.cdiv(S, ts))

    cost = pl.CostEstimate(
        flops=B * S * C,
        transcendentals=0,
        bytes_accessed=2 * B * S * C * itemsize + B * C * itemsize,
    )

    return pl.pallas_call(
        _mul_dropout3_kernel,
        out_shape=jax.ShapeDtypeStruct((B, S, C), x.dtype),
        grid_spec=pltpu.PrefetchScalarGridSpec(
            num_scalar_prefetch=0,
            grid=grid,
            in_specs=[
                pl.BlockSpec((tb, ts, tc), lambda b, c, s: (b, s, c)),
                pl.BlockSpec((tb, 1, tc), lambda b, c, s: (b, 0, c)),
            ],
            out_specs=pl.BlockSpec((tb, ts, tc), lambda b, c, s: (b, s, c)),
        ),
        compiler_params=pltpu.CompilerParams(
            dimension_semantics=("parallel", "parallel", "parallel"),
            vmem_limit_bytes=vmem_limit,
        ),
        cost_estimate=cost,
        input_output_aliases=({0: 0} if donate_x else {}),
    )(x, scaled_mask.astype(x.dtype))


def dropout3_forward(
    x: jax.Array,
    *,
    p: float,
    shared_dim: int,
    training: bool,
    rng_key: jax.Array,
    donate_x: bool = False,
) -> jax.Array:
    """Forward pass of Dropout3.

    Eval mode or p == 0 -> identity (_no_op). Otherwise draws a uniform keep
    mask with size 1 along `shared_dim` and applies x * mask * (1/(1-p)).
    Uses the Pallas kernel when the layout is (B, S, C), shared_dim == 1 and
    the channel dim is lane-dense; otherwise falls back to a fused XLA
    elementwise multiply (faster for tiny / oddly shaped inputs).
    """
    p = float(p)
    if (not training) or p == 0.0:
        return x  # _no_op

    nd = x.ndim
    sd = shared_dim % nd
    scale = 1.0 / (1.0 - p)

    rand_shape = list(x.shape)
    rand_shape[sd] = 1
    keep = jax.random.uniform(rng_key, tuple(rand_shape), dtype=jnp.float32) > p
    # Fold the 1/(1-p) scale into the small (B,1,C) mask once (cheap op) so the
    # kernel does a single full-size VPU multiply per element.
    # (Note: for bf16/fp16 this adds one low-precision rounding vs x*mask*scale
    # in f32; harmless for dropout.)
    scaled_mask = keep.astype(x.dtype) * jnp.asarray(scale, dtype=x.dtype)

    itemsize = jnp.dtype(x.dtype).itemsize
    use_pallas = (
        nd == 3
        and sd == 1
        and x.shape[-1] % 128 == 0            # lane-dense stores (no vst.msk)
        and x.size * itemsize >= 64 * 1024    # worth a kernel launch
    )
    if use_pallas:
        return mul_for_dropout3(x, scaled_mask, donate_x=donate_x)

    # Tiny or non-lane-dense shapes: let XLA fuse the broadcast multiply.
    return x * scaled_mask


if __name__ == "__main__":
    key = jax.random.PRNGKey(0)
    k1, k2, k3, k4, k5, k6 = jax.random.split(key, 6)

    p = 0.1                      # ScheduledFloat evaluates to a plain float
    shared_dim = 1               # mask shared across the sequence axis

    # --- Pallas path, f32, sequence-tiled shape ---
    B, S, C = 2, 64, 256
    x = jax.random.normal(k1, (B, S, C), dtype=jnp.float32)
    out = jax.block_until_ready(
        dropout3_forward(x, p=p, shared_dim=shared_dim, training=True, rng_key=k2)
    )
    keep_ref = jax.random.uniform(k2, (B, 1, C), dtype=jnp.float32) > p
    ref = x * (keep_ref.astype(x.dtype) * jnp.asarray(1.0 / (1.0 - p), x.dtype))
    assert out.shape == x.shape and out.dtype == x.dtype
    assert jnp.allclose(out, ref, atol=1e-6, rtol=1e-6), "Pallas f32 path mismatch"

    # --- Pallas path, bf16, short-sequence / batch-blocked shape ---
    Bb, Sb, Cb = 16, 8, 256
    xb = jax.random.normal(k3, (Bb, Sb, Cb), dtype=jnp.bfloat16)
    outb = jax.block_until_ready(
        dropout3_forward(xb, p=p, shared_dim=shared_dim, training=True, rng_key=k4)
    )
    keep_b = jax.random.uniform(k4, (Bb, 1, Cb), dtype=jnp.float32) > p
    ref_b = xb * (keep_b.astype(xb.dtype) * jnp.asarray(1.0 / (1.0 - p), xb.dtype))
    assert outb.shape == xb.shape and outb.dtype == xb.dtype
    assert jnp.allclose(outb.astype(jnp.float32), ref_b.astype(jnp.float32),
                        atol=1e-2, rtol=1e-2), "Pallas bf16 path mismatch"

    # --- Fallback path: tiny / non-128-multiple channel dim ---
    Bs, Ss, Cs = 2, 8, 32
    xs = jax.random.normal(k5, (Bs, Ss, Cs), dtype=jnp.float32)
    outs = jax.block_until_ready(
        dropout3_forward(xs, p=p, shared_dim=shared_dim, training=True, rng_key=k6)
    )
    keep_s = jax.random.uniform(k6, (Bs, 1, Cs), dtype=jnp.float32) > p
    refs = xs * (keep_s.astype(xs.dtype) * jnp.asarray(1.0 / (1.0 - p), xs.dtype))
    assert jnp.allclose(outs, refs, atol=1e-6, rtol=1e-6), "fallback mismatch"

    # --- Eval-mode / p == 0 path is the identity (_no_op) ---
    out_eval = dropout3_forward(
        x, p=p, shared_dim=shared_dim, training=False, rng_key=k2
    )
    assert jnp.array_equal(out_eval, x)
    out_p0 = dropout3_forward(
        x, p=0.0, shared_dim=shared_dim, training=True, rng_key=k2
    )
    assert jnp.array_equal(out_p0, x)

    print("KERNEL_OK")
</pallas_src>

<mosaic_0001>
module attributes {stable_mosaic.version = 11 : i64} {
  func.func @_mul_dropout3_kernel(%arg0: i32, %arg1: i32, %arg2: i32, %arg3: memref<1x32x256xf32, #tpu.memory_space<vmem>>, %arg4: memref<1x1x256xf32, #tpu.memory_space<vmem>>, %arg5: memref<1x32x256xf32, #tpu.memory_space<vmem>>) attributes {dimension_semantics = [#tpu.dimension_semantics<parallel>, #tpu.dimension_semantics<parallel>, #tpu.dimension_semantics<parallel>], iteration_bounds = array<i64: 2, 1, 2>, scalar_prefetch = 0 : i64, scratch_operands = 0 : i64, tpu.core_type = #tpu.core_type<tc>, window_params = [{transform_indices = @transform_0, window_bounds = array<i64: 1, 32, 256>}, {transform_indices = @transform_1, window_bounds = array<i64: 1, 1, 256>}, {transform_indices = @transform_2, window_bounds = array<i64: 1, 32, 256>}]} {
    %c0 = arith.constant 0 : index
    %c0_0 = arith.constant 0 : index
    %c0_1 = arith.constant 0 : index
    %0 = vector.load %arg3[%c0, %c0_0, %c0_1] : memref<1x32x256xf32, #tpu.memory_space<vmem>>, vector<1x32x256xf32>
    %c0_2 = arith.constant 0 : index
    %c0_3 = arith.constant 0 : index
    %c0_4 = arith.constant 0 : index
    %1 = vector.load %arg4[%c0_2, %c0_3, %c0_4] : memref<1x1x256xf32, #tpu.memory_space<vmem>>, vector<1x1x256xf32>
    %2 = vector.broadcast %1 : vector<1x1x256xf32> to vector<1x32x256xf32>
    %3 = arith.mulf %0, %2 : vector<1x32x256xf32>
    %c0_5 = arith.constant 0 : index
    %c0_6 = arith.constant 0 : index
    %c0_7 = arith.constant 0 : index
    %4 = vector.load %arg5[%c0_5, %c0_6, %c0_7] : memref<1x32x256xf32, #tpu.memory_space<vmem>>, vector<1x32x256xf32>
    tpu.vector_store %arg5[%c0_5, %c0_6, %c0_7], %3 {strides = array<i32>} : memref<1x32x256xf32, #tpu.memory_space<vmem>>, vector<1x32x256xf32>,
    return
  }
  func.func @transform_0(%arg0: i32, %arg1: i32, %arg2: i32) -> (i32, i32, i32) {
    %c0_i32 = arith.constant 0 : i32
    return %arg0, %arg2, %arg1 : i32, i32, i32
  }
  func.func @transform_1(%arg0: i32, %arg1: i32, %arg2: i32) -> (i32, i32, i32) {
    %c0_i32 = arith.constant 0 : i32
    %c0_i32_0 = arith.constant 0 : i32
    return %arg0, %c0_i32, %arg1 : i32, i32, i32
  }
  func.func @transform_2(%arg0: i32, %arg1: i32, %arg2: i32) -> (i32, i32, i32) {
    %c0_i32 = arith.constant 0 : i32
    return %arg0, %arg2, %arg1 : i32, i32, i32
  }
}

</mosaic_0001>

<bundles_post_ra>
// kernel: tpu_custom_call.1
= control target key start
LH: loop header
LB: loop body
LE: loop exit
PB: predicated region body
PF: predicated region fallthrough
CT: control target
= control target key end

     0   :  { %7 = vsyncpa [#allocation3], 0  ;;  %s1072_s0 = inlined_call_operand.hbm [shape: f32[2,64,256], index: 0, kind: input, shape index: {}]   ;;  %s1073_s1 = inlined_call_operand.hbm [shape: f32[2,1,256], index: 1, kind: input, shape index: {}]   ;;  %s1074_s2 = inlined_call_operand.hbm [shape: f32[2,64,256], index: 2, kind: output, shape index: {}]  }
   0x1   :  { %9 = vsyncpa [#allocation3 + $0x1], 0 }
   0x2   :  { %10 = vsyncpa [#allocation6], 0 }
   0x3   :  { %12 = vsyncpa [#allocation6 + $0x1], 0 }
   0x4   :  { %13 = vsyncpa [#allocation4], 0 }
   0x5   :  { %15 = vsyncpa [#allocation4 + $0x1], 0  ;;  %s766_s9 = smov 0   ;;  %s768_s10 = smov 0  }
   0x6   :  { %s770_s11 = smov 0   ;;  %s772_s12 = smov 0  }
   0x7   :  { %s774_s13 = smov 0   ;;  %s776_s14 = smov 0  }
   0x8   :  { %s778_s15 = smov 0   ;;  %s780_s16 = smov 0  }
   0x9   :  { %s782_s17 = smov 0   ;;  %s784_s18 = smov 0  }
   0xa   :  { %s786_s19 = smov 0  }
   0xb LB: > { %s420_s20 = sadd.s32 4294967294, %s742_s19   ;;  %s33_s21 = sadd.s32 1, %s734_s17  ;;  %s742_s19 = sphi %s786_s19, %s21_s19   ;;  %s738_s18 = sphi %s784_s18, %s1117_s18   ;;  %s734_s17 = sphi %s782_s17, %s1116_s17   ;;  %s730_s16 = sphi %s780_s16, %s1115_s16   ;;  %s726_s15 = sphi %s778_s15, %s1114_s15   ;;  %s722_s14 = sphi %s776_s14, %s1113_s14   ;;  %s718_s13 = sphi %s774_s13, %s1112_s13   ;;  %s714_s12 = sphi %s772_s12, %s1111_s12   ;;  %s710_s11 = sphi %s770_s11, %s1110_s11   ;;  %s706_s10 = sphi %s768_s10, %s1109_s10   ;;  %s702_s9 = sphi %s766_s9, %s1108_s9  }
   0xc   : > { %p34_p0 = scmp.ge.s32.totalorder %s33_s21, 2  ;;  %s40_s22 = sadd.s32 1, %s738_s18 }
   0xd   : > { %s51_s23 = sadd.s32 1, %s722_s14  ;;  %p1079_p1 = scmp.ne.s32.totalorder %s722_s14, %s718_s13 }
   0xe   : > { %s1119_s21 = smov (%p34_p0, %s33_s21), 0  ;;  %s1121_s22 = smov (!%p34_p0, %s40_s22), %s738_s18 }
   0xf   : > { %1085 = sst [smem:[#allocation11_spill]] %s1119_s21  ;;  %s45_s24 = ssub.s32 %s734_s17, %s1119_s21 }
  0x10   : > { %p1080_p2 = scmp.eq.s32.totalorder %s742_s19, 0  ;;  %p42_p3 = scmp.ge.s32.totalorder %s1121_s22, 2 }
  0x11   : > { %p1081_p4 = scmp.ne.s32.totalorder %s718_s13, %s714_s12  ;;  %p126_p6 = scmp.eq.s32.totalorder %s420_s20, 3 }
  0x12   : > { %p840_p5 = por %p1080_p2, %p1079_p1  ;;  %s1123_s22 = smov (%p42_p3, %s1121_s22), 0 }
  0x13   : > { %1087 = sst [smem:[#allocation12_spill]] %s1123_s22  ;;  %p849_p7 = por %p126_p6, %p1081_p4 }
  0x14   : > { %s855_s27 = ssub.s32 %s738_s18, %s1123_s22  ;;  %p1078_p8 = scmp.lt.s32.totalorder %s742_s19, 4 }
  0x15   : > { %s1088_s26 = scalar_select %p849_p7, 1, 0 }
  0x16   : > { %s46_s28 = sor.u32 %s45_s24, %s855_s27  ;;  %s146_s29 = sand.u32 1, %s722_s14  }
  0x17   : > { %1089 = sst [smem:[#allocation13_spill]] %s1088_s26  ;;  %p49_p9 = scmp.eq.s32.totalorder %s46_s28, 0 }
  0x18   : > { %s423_s30 = sshll.u32 %s146_s29, 6  ;;  %s442_s3 = sshll.u32 %s734_s17, 3 }
  0x19   : > { %s862_s4 = scalar_select %p49_p9, %s722_s14, %s51_s23  }
  0x1a   : > { %s426_s5 = sshll.u32 %s738_s18, 4  ;;  %s150_s7 = scalar_lea.vmem [#allocation2], %s423_s30 }
  0x1b   : > { %s159_s6 = sadd.s32 %s442_s3, %s426_s5  ;;  %s162_s8 = sshll.u32 %s150_s7, 4  ;;  %s865_s8 = int_to_ptr.vmem [resolvable:$true] %s162_s8 }
  0x1c   : > { %s427_s20 = sshll.u32 %s159_s6, 7  ;;  %p876_p10 = pnand %p1078_p8, %p840_p5 }
  0x1d   : > { %s870_s26 = scalar_lea.hbm %s1072_s0, %s427_s20  ;;  %s881_s24 = scalar_lea.sflag [#allocation3], %s146_s29 }
  0x1e   : > { %s556_s28 = scalar_lea.hbm %s870_s26, 1024  ;;  %p558_p13 = pneg %p876_p10 }
  0x1f   : > { %p557_p12 = scmp.ne.s32.totalorder %s870_s26, %s556_s28  ;;  %s561_s25 = scalar_lea.hbm %s1072_s0, 4096 }
  0x20   : > { %p562_p5 = scmp.lt.u32.totalorder %s870_s26, %s1072_s0  ;;  %p563_p6 = scmp.lt.u32.totalorder %s561_s25, %s556_s28 }
  0x21   : > { %p559_p0 = pnand %p558_p13, %p557_p12  ;;  %p565_p8 = scmp.lt.u32.totalorder %s556_s28, %s870_s26 }
  0x22   : > { %p564_p9 = por %p563_p6, %p562_p5 }
  0x23   : > { %p560_p3 = pneg %p559_p0 }
  0x24   : > { %p566_p1 = por %p565_p8, %p564_p9 }
  0x26   : > { %p567_p2 = pnand %p566_p1, %p560_p3 }
  0x28   : > { %570 = shalt.err (!%p567_p2)
}
  0x29   : > { %s571_s29 = scalar_lea.vmem %s865_s8, 1024  ;;  %s744_s5 = smov [#allocation2]  }
  0x2a   : > { %p572_p12 = scmp.ne.s32.totalorder %s865_s8, %s571_s29  ;;  %s576_s6 = sshll.u32 %s744_s5, 4  ;;  %s577_s6 = int_to_ptr.vmem [resolvable:$false] %s576_s6 }
  0x2b   : > { %s578_s7 = scalar_lea.vmem %s577_s6, 2048  ;;  %p579_p11 = scmp.lt.s32.totalorder %s865_s8, %s577_s6 }
  0x2c   : > { %p574_p0 = pnand %p572_p12, %p558_p13  ;;  %p580_p5 = scmp.lt.s32.totalorder %s578_s7, %s571_s29 }
  0x2e   : > { %p575_p4 = pneg %p574_p0  ;;  %p581_p6 = por %p580_p5, %p579_p11 }
  0x30   : > { %p582_p8 = pnand %p581_p6, %p575_p4 }
  0x32   : > { %585 = shalt.err (!%p582_p8)
}
  0x33   : > { %s745_s20 = smov 256   ;;  %s746_s28 = smov 16  }
  0x34   : > { %454 = dma.hbm_to_vmem [thread:$0]  (!%p876_p10), %s870_s26, 1024, %s865_s8, %s881_s24, %s745_s20, %s745_s20, %s746_s28  }
  0x35   : > { %p191_p1 = scmp.lt.s32.totalorder %s742_s19, 5  ;;  %p1091_p2 = scmp.ge.s32.totalorder %s742_s19, 1 }
  0x36   : > { %s419_s22 = sadd.s32 4294967295, %s742_s19   ;;  %p77_p11 = scmp.eq.s32.totalorder %s855_s27, 0 }
  0x37   : > { %p912_p4 = pnand %p1091_p2, %p191_p1  ;;  %p65_p13 = scmp.eq.s32.totalorder %s419_s22, 0 }
  0x38   : > { %s79_s25 = sadd.s32 1, %s710_s11  ;;  %p1093_p3 = scmp.ne.s32.totalorder %s718_s13, %s714_s12 }
  0x39   : > { %s920_s30 = scalar_select %p77_p11, %s710_s11, %s79_s25  }
  0x3a   : > { %p925_p9 = por %p65_p13, %p1093_p3  ;;  %p86_p10 = scmp.ne.s32.totalorder %s710_s11, %s706_s10 }
  0x3b   : > { %p92_p12 = scmp.ne.s32.totalorder %s706_s10, %s702_s9  ;;  %p120_p0 = scmp.eq.s32.totalorder %s419_s22, 3 }
  0x3c   : > { %s1094_s23 = scalar_select %p925_p9, 1, 0 }
  0x3d   : > { %p1095_p5 = scmp.eq.s32.totalorder %s742_s19, 0  ;;  %s172_s26 = sand.u32 1, %s710_s11  }
  0x3e   : > { %p936_p8 = por %p92_p12, %p65_p13  ;;  %p1097_p1 = scmp.ne.s32.totalorder %s722_s14, %s718_s13 }
  0x3f   : > { %p88_p6 = por %p86_p10, %p1095_p5  ;;  %s428_s24 = sshll.u32 %s172_s26, 1 }
  0x40   : > { %s1096_s8 = scalar_select %p936_p8, 1, 0 }
  0x41   : > { %p943_p2 = por %p120_p0, %p1097_p1  ;;  %s443_s3 = sshll.u32 %s738_s18, 5 }
  0x42   : > { %s951_s6 = scalar_lea.hbm %s1073_s1, %s443_s3  ;;  %s176_s9 = scalar_lea.vmem [#allocation5], %s428_s24 }
  0x43   : > { %s1098_s27 = scalar_select %p943_p2, 1, 0 }
  0x44   : > { %s186_s7 = sshll.u32 %s176_s9, 4  ;;  %p1099_p11 = scmp.lt.s32.totalorder %s742_s19, 4  ;;  %s953_s7 = int_to_ptr.vmem [resolvable:$true] %s186_s7 }
  0x45   : > { %s173_s28 = scalar_lea.sflag [#allocation6], %s172_s26  ;;  %s586_s22 = scalar_lea.hbm %s951_s6, 32 }
  0x46   : > { %p957_p13 = pnand %p1099_p11, %p88_p6  ;;  %p587_p3 = scmp.ne.s32.totalorder %s951_s6, %s586_s22 }
  0x47   : > { %s591_s3 = scalar_lea.hbm %s1073_s1, 64  ;;  %p592_p5 = scmp.lt.u32.totalorder %s951_s6, %s1073_s1 }
  0x48   : > { %p588_p10 = pneg %p957_p13  ;;  %p593_p6 = scmp.lt.u32.totalorder %s591_s3, %s586_s22 }
  0x49   : > { %p595_p11 = scmp.lt.u32.totalorder %s586_s22, %s951_s6 }
  0x4a   : > { %p589_p12 = pnand %p588_p10, %p587_p3  ;;  %p594_p1 = por %p593_p6, %p592_p5 }
  0x4c   : > { %p590_p0 = pneg %p589_p12  ;;  %p596_p7 = por %p595_p11, %p594_p1 }
  0x4e   : > { %p597_p2 = pnand %p596_p7, %p590_p0 }
  0x50   : > { %600 = shalt.err (!%p597_p2)
}
  0x51   : > { %s601_s26 = scalar_lea.vmem %s953_s7, 32  ;;  %s747_s9 = smov [#allocation5]  }
  0x52   : > { %p602_p3 = scmp.ne.s32.totalorder %s953_s7, %s601_s26  ;;  %s606_s25 = sshll.u32 %s747_s9, 4  ;;  %s607_s25 = int_to_ptr.vmem [resolvable:$false] %s606_s25 }
  0x53   : > { %s608_s24 = scalar_lea.vmem %s607_s25, 64  ;;  %p609_p9 = scmp.lt.s32.totalorder %s953_s7, %s607_s25 }
  0x54   : > { %p604_p12 = pnand %p602_p3, %p588_p10  ;;  %p610_p5 = scmp.lt.s32.totalorder %s608_s24, %s601_s26 }
  0x56   : > { %p605_p8 = pneg %p604_p12  ;;  %p611_p6 = por %p610_p5, %p609_p9 }
  0x58   : > { %p612_p1 = pnand %p611_p6, %p605_p8 }
  0x5a   : > { %615 = shalt.err (!%p612_p1)
}
  0x5b   : > { %457 = dma.hbm_to_vmem [thread:$0]  (!%p957_p13), %s951_s6, 32, %s953_s7, %s173_s28  }
  0x5c   : > { %195 = sbr.rel (%p912_p4) target bundleno = 132 (0x84), region = 28  ;;  %s989_s22 = sand.u32 (!%p912_p4), 1, %s718_s13  }
  0x5d   : > { %s432_s3 = sshll.u32 (!%p912_p4), %s989_s22, 6  ;;  %s198_s29 = scalar_lea.sflag (!%p912_p4), [#allocation3], %s989_s22 }
  0x5e   : > { %s201_s5 = scalar_lea.vmem (!%p912_p4), [#allocation2], %s432_s3  ;;  %p1101_p7 = scmp.ne.s32.totalorder (!%p912_p4), %s1094_s23, 0 }
  0x63   : > { %689 = dma.done.wait (%p1101_p7), %s198_s29, 1024  }
  0x64   : > { %691 = vsyncadd (%p1101_p7), %s198_s29, 4294966272  ;;  %s206_s6 = sand.u32 1, %s706_s10   ;;  %p1102_p4 = scmp.ne.s32.totalorder %s1096_s8, 0 }
  0x65   : > { %s433_s7 = sshll.u32 %s206_s6, 1  ;;  %s207_s21 = scalar_lea.sflag [#allocation6], %s206_s6 }
  0x66   : > { %s210_s20 = scalar_lea.vmem [#allocation5], %s433_s7 }
  0x67   : > { %693 = dma.done.wait (%p1102_p4), %s207_s21, 32  }
  0x68   : > { %695 = vsyncadd (%p1102_p4), %s207_s21, 4294967264  ;;  %v251_v0 = vlaneseq  ;;  %s444_s28 = sshll.u32 %s726_s15, 3  ;;  %s438_s26 = sshll.u32 %s730_s16, 4  ;;  %v241_v4 = vld [vmem:[%s201_s5] sm:$0xff]  ;;  %v242_v6 = vld [vmem:[%s201_s5 + $0x8] sm:$0xff] }
  0x69   : > { %s293_s23 = sadd.s32 %s444_s28, %s438_s26  ;;  %v249_v5 = vld [vmem:[%s210_s20] sm:$0x3]  ;;  %s235_s9 = scalar_lea.vmem [#allocation7], %s432_s3  ;;  %v243_v9 = vld [vmem:[%s201_s5 + $0x10] sm:$0xff]  ;;  %v244_v10 = vld [vmem:[%s201_s5 + $0x18] sm:$0xff] }
  0x6a   : > { %v252_v1 = vshrl.u32 %v251_v0, 7  ;;  %s296_s25 = sshll.u32 %s235_s9, 4  ;;  %v245_v11 = vld [vmem:[%s201_s5 + $0x20] sm:$0xff]  ;;  %s439_s8 = sshll.u32 %s293_s23, 7  ;;  %v246_v12 = vld [vmem:[%s201_s5 + $0x28] sm:$0xff]  ;;  %v247_v13 = vld [vmem:[%s201_s5 + $0x30] sm:$0xff]  ;;  %s1004_s25 = int_to_ptr.vmem [resolvable:$true] %s296_s25 }
  0x6b   : > { %v248_v14 = vld [vmem:[%s201_s5 + $0x38] sm:$0xff]  ;;  %s1009_s24 = scalar_lea.hbm %s1074_s2, %s439_s8  ;;  %s278_s3 = scalar_lea.sflag [#allocation4], %s989_s22 }
  0x6c   : > { %v253_v2 = vsub.s32 0, %v252_v1  ;;  %v257_v3 = vsub.s32 1, %v252_v1  ;;  %s616_s29 = scalar_lea.vmem %s1004_s25, 1024  ;;  %p1103_p8 = scmp.ne.s32.totalorder %s1098_s27, 0 }
  0x6d   : > { %p617_p9 = scmp.ne.s32.totalorder %s1004_s25, %s616_s29  ;;  %s748_s5 = smov [#allocation7]  }
  0x6e   : > { %v254_v7 = vrot.slane %v249_v5, %v253_v2  ;;  %v258_v8 = vrot.slane %v249_v5, %v257_v3  ;;  %s620_s6 = sshll.u32 %s748_s5, 4  ;;  %s621_s6 = int_to_ptr.vmem [resolvable:$false] %s620_s6 }
  0x6f   : > { %p618_p2 = pnand %p617_p9, %p1103_p8  ;;  %s622_s7 = scalar_lea.vmem %s621_s6, 2048 }
  0x70   : > { %v261_v15 = vmul.f32 %v254_v7, %v241_v4  ;;  %v262_v16 = vmul.f32 %v258_v8, %v242_v6  ;;  %v263_v17 = vmul.f32 %v254_v7, %v243_v9  ;;  %v264_v18 = vmul.f32 %v258_v8, %v244_v10  ;;  %p623_p10 = scmp.lt.s32.totalorder %s1004_s25, %s621_s6  ;;  %p624_p0 = scmp.lt.s32.totalorder %s622_s7, %s616_s29 }
  0x71   : > { %v265_v19 = vmul.f32 %v254_v7, %v245_v11  ;;  %v266_v20 = vmul.f32 %v258_v8, %v246_v12  ;;  %v267_v21 = vmul.f32 %v254_v7, %v247_v13  ;;  %v268_v22 = vmul.f32 %v258_v8, %v248_v14  ;;  %p619_p13 = pneg %p618_p2 }
  0x72   : > { %269 = vst [vmem:[%s235_s9] sm:$0xff] %v261_v15  ;;  %270 = vst [vmem:[%s235_s9 + $0x8] sm:$0xff] %v262_v16  ;;  %p625_p11 = por %p624_p0, %p623_p10 }
  0x73   : > { %271 = vst [vmem:[%s235_s9 + $0x10] sm:$0xff] %v263_v17  ;;  %272 = vst [vmem:[%s235_s9 + $0x18] sm:$0xff] %v264_v18 }
  0x74   : > { %273 = vst [vmem:[%s235_s9 + $0x20] sm:$0xff] %v265_v19  ;;  %274 = vst [vmem:[%s235_s9 + $0x28] sm:$0xff] %v266_v20  ;;  %p626_p3 = pnand %p625_p11, %p619_p13 }
  0x75   : > { %275 = vst [vmem:[%s235_s9 + $0x30] sm:$0xff] %v267_v21  ;;  %276 = vst [vmem:[%s235_s9 + $0x38] sm:$0xff] %v268_v22 }
  0x76   : > { %629 = shalt.err (!%p626_p3)
}
  0x77   : > { %s630_s21 = scalar_lea.hbm %s1009_s24, 1024  ;;  %s634_s26 = scalar_lea.hbm %s1074_s2, 4096 }
  0x78   : > { %p631_p12 = scmp.ne.s32.totalorder %s1009_s24, %s630_s21  ;;  %p635_p1 = scmp.lt.u32.totalorder %s1009_s24, %s1074_s2 }
  0x79   : > { %p636_p7 = scmp.lt.u32.totalorder %s634_s26, %s630_s21  ;;  %p638_p9 = scmp.lt.u32.totalorder %s630_s21, %s1009_s24 }
  0x7a   : > { %p632_p5 = pnand %p631_p12, %p1103_p8 }
  0x7b   : > { %p637_p4 = por %p636_p7, %p635_p1 }
  0x7c   : > { %p633_p6 = pneg %p632_p5 }
  0x7d   : > { %p639_p2 = por %p638_p9, %p637_p4 }
  0x7f   : > { %p640_p13 = pnand %p639_p2, %p633_p6 }
  0x81   : > { %643 = shalt.err (!%p640_p13)
}
  0x82   : > { %s749_s8 = smov 256   ;;  %s750_s15 = smov 16  }
  0x83   : > { %449 = dma.vmem_to_hbm [thread:$0]  (%p1103_p8), %s1004_s25, 1024, %s1009_s24, %s278_s3, %s749_s8, %s749_s8, %s750_s15  }
  0x84 PF: > { %s1104_s16 = sld [smem:[#allocation13_spill]]  ;;  %p463_p10 = scmp.ge.s32.totalorder %s742_s19, 2 }
  0x85   : > { %s311_s29 = sand.u32 1, %s714_s12  }
  0x86   : > { %s312_s5 = scalar_lea.sflag [#allocation4], %s311_s29 }
  0x8a   : > { %p1105_p0 = scmp.ne.s32.totalorder %s1104_s16, 0 }
  0x8c   : > { %p459_p11 = pnand %p463_p10, %p1105_p0 }
  0x8e   : > { %697 = dma.done.wait (!%p459_p11), %s312_s5, 1024  }
  0x8f   : > { %699 = vsyncadd (!%p459_p11), %s312_s5, 4294966272  ;;  %s21_s19 = sadd.s32 1, %s742_s19   ;;  %s1106_s27 = sld [smem:[#allocation11_spill]] }
  0x90   : > { %p18_p3 = scmp.ge.s32.totalorder %s21_s19, 6   ;;  %s1107_s22 = sld [smem:[#allocation12_spill]] }
  0x91   : > { %s1108_s9 = smov %s706_s10  ;;  %s1109_s10 = smov %s710_s11 }
  0x92   : > { %s1110_s11 = smov %s920_s30  ;;  %s1111_s12 = smov %s718_s13 }
  0x93   : > { %s1112_s13 = smov %s722_s14  ;;  %s1113_s14 = smov %s862_s4 }
  0x94   : > { %s1114_s15 = smov %s734_s17  ;;  %s1115_s16 = smov %s738_s18 }
  0x95   : > { %s1116_s17 = smov %s1106_s27  ;;  %20 = sbr.rel (!%p18_p3) target bundleno = 11 (0xb), region = 86 }
  0x96   : > { %s1117_s18 = smov %s1107_s22 }
  0x9c   :  { %317 = vsyncpa [#allocation3], 1 }
  0x9d   :  { %319 = vsyncpa [#allocation3 + $0x1], 1 }
  0x9e   :  { %320 = vsyncpa [#allocation6], 1 }
  0x9f   :  { %322 = vsyncpa [#allocation6 + $0x1], 1 }
  0xa0   :  { %323 = vsyncpa [#allocation4], 1 }
  0xa1   :  { %325 = vsyncpa [#allocation4 + $0x1], 1 }

</bundles_post_ra>
